<compile_context>
chip_gen: v6e
topology: v6e:2x2x1
jax: 0.10.0
libtpu: 0.0.40
codegen_flags: <defaults>
</compile_context>

<pallas_src>
import jax
import jax.numpy as jnp
from jax.experimental import pallas as pl
from jax.experimental.pallas import tpu as pltpu


def _mha_fused_kernel(x_ref, w_qkv_ref, mask_ref, w_proj_ref, b_proj_ref, o_ref):
    # x_ref      : (Bg, T, C)   one batch group's tokens (f32)
    # w_qkv_ref  : (3H, C, Hs)  per-(q/k/v, head) weights, scale folded into Q, bf16
    # mask_ref   : (T, T)       additive causal bias (0 allowed / -1e30 masked), f32
    # w_proj_ref : (H, Hs, E)   output projection split per head (in, out), bf16
    # b_proj_ref : (1, E)       f32
    # o_ref      : (Bg, T, E)
    bg, t, c = x_ref.shape
    three_h, _, hs = w_qkv_ref.shape
    h = three_h // 3
    e = h * hs
    m = bg * t

    # Flatten the batch group into the matmul M dimension (leading-dim reshape,
    # layout-preserving: token index stays the sublane/row axis).
    x = x_ref[...].reshape(m, c).astype(jnp.bfloat16)

    # Head-and-type-batched QKV projection: bf16 operands, f32 accumulation.
    # Result is already (q/k/v, head)-major on the leading axis, so q/k/v below
    # are cheap leading-dim slices -- no sub-128-lane slicing anywhere.
    xb = jnp.broadcast_to(x[None, :, :], (three_h, m, c))
    qkv = jnp.einsum('bmc,bcd->bmd', xb, w_qkv_ref[...],
                     preferred_element_type=jnp.float32)          # (3H, M, Hs) f32

    # (H, Bg*T, Hs) -> (H*Bg, T, Hs): pure leading-dim regroup (same flat order).
    q = qkv[0 * h:1 * h].reshape(h * bg, t, hs)   # scale already folded into Wq
    k = qkv[1 * h:2 * h].reshape(h * bg, t, hs)
    v = qkv[2 * h:3 * h].reshape(h * bg, t, hs)

    # Scores (bf16 MXU operands, f32 accumulate) + causal softmax in f32.
    s = jnp.einsum('bqd,bkd->bqk',
                   q.astype(jnp.bfloat16), k.astype(jnp.bfloat16),
                   preferred_element_type=jnp.float32)            # (H*Bg, T, T)
    s = s + mask_ref[...][None, :, :]                             # f32 mask add
    s = s - jnp.max(s, axis=-1, keepdims=True)
    p = jnp.exp(s)
    p = p * pl.reciprocal(jnp.sum(p, axis=-1, keepdims=True), approx=True)

    attn = jnp.einsum('bqk,bkd->bqd',
                      p.astype(jnp.bfloat16), v.astype(jnp.bfloat16),
                      preferred_element_type=jnp.float32)         # (H*Bg, T, Hs)

    # Head concat + output projection folded together:
    #   concat_h(attn_h) @ Wproj  ==  sum_h attn_h @ Wproj[h*Hs:(h+1)*Hs, :]
    attn = attn.reshape(h, m, hs).astype(jnp.bfloat16)            # leading-dim regroup
    out_h = jnp.einsum('hmd,hde->hme', attn, w_proj_ref[...],
                       preferred_element_type=jnp.float32)        # (H, M, E)
    out = jnp.sum(out_h, axis=0) + b_proj_ref[...]                # (M, E) + (1, E)

    # Lane-dense (B, T, E) output written directly (E=32 forces masked stores
    # today; keep the last dim a multiple of 128 if E grows).
    o_ref[...] = out.reshape(bg, t, e).astype(o_ref.dtype)


def prepare_mha_params(wq, wk, wv, w_proj, b_proj, n_embed):
    """One-time weight preparation (hoisted out of the per-call path).

    wq/wk/wv : (H, C, Hs) pre-transposed so the kernel computes x @ W.
    w_proj   : (E, E) stored (in, out).   b_proj : (E,).
    Returns bf16 fused weights with the nanogpt score scale (C**-0.5, i.e.
    n_embed**-0.5 -- intentionally NOT head_size**-0.5) folded into Wq.
    """
    H, C, Hs = wq.shape
    E = H * Hs
    scale = float(n_embed) ** -0.5
    w_qkv = jnp.concatenate([wq * scale, wk, wv], axis=0).astype(jnp.bfloat16)  # (3H, C, Hs)
    w_proj_h = w_proj.reshape(H, Hs, E).astype(jnp.bfloat16)                    # (H, Hs, E)
    b_proj2 = b_proj.reshape(1, E).astype(jnp.float32)                          # (1, E)
    return w_qkv, w_proj_h, b_proj2


def causal_bias(T):
    """Additive causal bias (finite large-negative, not -inf). Built once."""
    tril = jnp.tril(jnp.ones((T, T), dtype=bool))
    return jnp.where(tril, 0.0, -1e30).astype(jnp.float32)


def multi_head_attention(x, w_qkv, w_proj_h, b_proj2, mask_bias):
    """x: (B, T, C); weights pre-fused via prepare_mha_params; mask via causal_bias."""
    B, T, C = x.shape
    three_h, _, Hs = w_qkv.shape
    H = three_h // 3
    E = H * Hs

    # At most 2 grid steps, regardless of B: a 2-way "parallel" split keeps both
    # v7x TensorCores busy, while each step folds its whole batch group into the
    # matmul M dimension (no per-sequence grid steps).
    G = 2 if (B >= 2 and B % 2 == 0) else 1
    Bg = B // G

    out = pl.pallas_call(
        _mha_fused_kernel,
        out_shape=jax.ShapeDtypeStruct((B, T, E), x.dtype),
        grid_spec=pltpu.PrefetchScalarGridSpec(
            num_scalar_prefetch=0,
            grid=(G,),
            in_specs=[
                pl.BlockSpec((Bg, T, C), lambda g: (g, 0, 0)),        # x (batch group)
                pl.BlockSpec((three_h, C, Hs), lambda g: (0, 0, 0)),  # fused QKV weights (resident)
                pl.BlockSpec((T, T), lambda g: (0, 0)),               # causal bias (resident)
                pl.BlockSpec((H, Hs, E), lambda g: (0, 0, 0)),        # proj weight (resident)
                pl.BlockSpec((1, E), lambda g: (0, 0)),               # proj bias (resident)
            ],
            out_specs=pl.BlockSpec((Bg, T, E), lambda g: (g, 0, 0)),
        ),
        compiler_params=pltpu.CompilerParams(
            dimension_semantics=("parallel",)),
    )(x, w_qkv, mask_bias, w_proj_h, b_proj2)
    return out


def _reference(x, wq, wk, wv, w_proj, b_proj):
    # Pure-JAX f32 reference mirroring the PyTorch forward (eval mode).
    B, T, C = x.shape
    scale = C ** -0.5
    heads = []
    for h in range(wq.shape[0]):
        q = x @ wq[h]
        k = x @ wk[h]
        v = x @ wv[h]
        s = (q @ jnp.swapaxes(k, -2, -1)) * scale
        mask = jnp.tril(jnp.ones((T, T), bool))
        s = jnp.where(mask, s, -jnp.inf)
        p = jax.nn.softmax(s, axis=-1)
        heads.append(p @ v)
    cat = jnp.concatenate(heads, axis=-1)
    return cat @ w_proj + b_proj


if __name__ == "__main__":
    # Small shapes consistent with the module: n_embed = num_heads * head_size.
    B, T = 2, 8
    num_heads, head_size = 4, 8
    n_embed = num_heads * head_size  # 32

    key = jax.random.PRNGKey(0)
    kx, kq, kk, kv, kp, kb = jax.random.split(key, 6)

    x = jax.random.normal(kx, (B, T, n_embed), jnp.float32)
    # nn.Linear(n_embed, head_size, bias=False) weight is (head_size, n_embed);
    # we store the transpose (n_embed, head_size) per head so the kernel does x @ W.
    bound = n_embed ** -0.5
    wq = jax.random.uniform(kq, (num_heads, n_embed, head_size), jnp.float32, -bound, bound)
    wk = jax.random.uniform(kk, (num_heads, n_embed, head_size), jnp.float32, -bound, bound)
    wv = jax.random.uniform(kv, (num_heads, n_embed, head_size), jnp.float32, -bound, bound)
    # proj: nn.Linear(n_embed, n_embed) -> store transposed (in, out) + bias.
    w_proj = jax.random.uniform(kp, (n_embed, n_embed), jnp.float32, -bound, bound)
    b_proj = jax.random.uniform(kb, (n_embed,), jnp.float32, -bound, bound)

    # One-time (init-path) weight fusion / scale fold / bf16 cast / mask build.
    w_qkv, w_proj_h, b_proj2 = prepare_mha_params(wq, wk, wv, w_proj, b_proj, n_embed)
    mask_bias = causal_bias(T)

    out = jax.block_until_ready(
        multi_head_attention(x, w_qkv, w_proj_h, b_proj2, mask_bias))
    ref = _reference(x, wq, wk, wv, w_proj, b_proj)
    assert out.shape == (B, T, n_embed)
    # Tolerance accounts for bf16 MXU operands + approx (EUP) reciprocal in softmax.
    assert jnp.allclose(out, ref, atol=2e-2, rtol=2e-2), "mismatch vs reference"
    print("KERNEL_OK")
</pallas_src>

<mosaic_0001>
module attributes {stable_mosaic.version = 11 : i64} {
  func.func @_mha_fused_kernel(%arg0: i32, %arg1: memref<1x8x32xf32, #tpu.memory_space<vmem>>, %arg2: memref<12x32x8xbf16, #tpu.memory_space<vmem>>, %arg3: memref<8x8xf32, #tpu.memory_space<vmem>>, %arg4: memref<4x8x32xbf16, #tpu.memory_space<vmem>>, %arg5: memref<1x32xf32, #tpu.memory_space<vmem>>, %arg6: memref<1x8x32xf32, #tpu.memory_space<vmem>>) attributes {dimension_semantics = [#tpu.dimension_semantics<parallel>], iteration_bounds = array<i64: 2>, scalar_prefetch = 0 : i64, scratch_operands = 0 : i64, tpu.core_type = #tpu.core_type<tc>, window_params = [{transform_indices = @transform_0, window_bounds = array<i64: 1, 8, 32>}, {pipeline_mode = #tpu.pipeline_mode<synchronous>, transform_indices = @transform_1, window_bounds = array<i64: 12, 32, 8>}, {pipeline_mode = #tpu.pipeline_mode<synchronous>, transform_indices = @transform_2, window_bounds = array<i64: 8, 8>}, {pipeline_mode = #tpu.pipeline_mode<synchronous>, transform_indices = @transform_3, window_bounds = array<i64: 4, 8, 32>}, {pipeline_mode = #tpu.pipeline_mode<synchronous>, transform_indices = @transform_4, window_bounds = array<i64: 1, 32>}, {transform_indices = @transform_5, window_bounds = array<i64: 1, 8, 32>}]} {
    %c0 = arith.constant 0 : index
    %c0_0 = arith.constant 0 : index
    %c0_1 = arith.constant 0 : index
    %0 = vector.load %arg1[%c0, %c0_0, %c0_1] : memref<1x8x32xf32, #tpu.memory_space<vmem>>, vector<1x8x32xf32>
    %1 = vector.shape_cast %0 : vector<1x8x32xf32> to vector<8x32xf32>
    %2 = arith.truncf %1 : vector<8x32xf32> to vector<8x32xbf16>
    %3 = vector.shape_cast %2 : vector<8x32xbf16> to vector<1x8x32xbf16>
    %4 = vector.shape_cast %3 : vector<1x8x32xbf16> to vector<1x8x32xbf16>
    %5 = vector.broadcast %4 : vector<1x8x32xbf16> to vector<12x8x32xbf16>
    %c0_2 = arith.constant 0 : index
    %c0_3 = arith.constant 0 : index
    %c0_4 = arith.constant 0 : index
    %6 = vector.load %arg2[%c0_2, %c0_3, %c0_4] : memref<12x32x8xbf16, #tpu.memory_space<vmem>>, vector<12x32x8xbf16>
    "tpu.trace_start"() <{level = 10 : i32, message = "bmc,bcd->bmd"}> : () -> ()
    %cst = arith.constant dense<0.000000e+00> : vector<12x8x8xf32>
    %7 = tpu.matmul %5, %6, %cst {dimension_numbers = #tpu.dot_dimension_numbers<[2], [1], [1], [2], [0, 0, 0, 1, 1, 2], [0], [0]>} : vector<12x8x32xbf16>, vector<12x32x8xbf16>, vector<12x8x8xf32> -> vector<12x8x8xf32>
    "tpu.trace_stop"() : () -> ()
    %8 = vector.extract_strided_slice %7 {offsets = [0, 0, 0], sizes = [4, 8, 8], strides = [1, 1, 1]} : vector<12x8x8xf32> to vector<4x8x8xf32>
    %9 = vector.extract_strided_slice %7 {offsets = [4, 0, 0], sizes = [4, 8, 8], strides = [1, 1, 1]} : vector<12x8x8xf32> to vector<4x8x8xf32>
    %10 = vector.extract_strided_slice %7 {offsets = [8, 0, 0], sizes = [4, 8, 8], strides = [1, 1, 1]} : vector<12x8x8xf32> to vector<4x8x8xf32>
    %11 = arith.truncf %8 : vector<4x8x8xf32> to vector<4x8x8xbf16>
    %12 = arith.truncf %9 : vector<4x8x8xf32> to vector<4x8x8xbf16>
    "tpu.trace_start"() <{level = 10 : i32, message = "bqd,bkd->bqk"}> : () -> ()
    %cst_5 = arith.constant dense<0.000000e+00> : vector<4x8x8xf32>
    %13 = tpu.matmul %11, %12, %cst_5 {dimension_numbers = #tpu.dot_dimension_numbers<[2], [2], [1], [1], [0, 0, 0, 1, 1, 1], [0], [0]>} : vector<4x8x8xbf16>, vector<4x8x8xbf16>, vector<4x8x8xf32> -> vector<4x8x8xf32>
    "tpu.trace_stop"() : () -> ()
    %c0_6 = arith.constant 0 : index
    %c0_7 = arith.constant 0 : index
    %14 = vector.load %arg3[%c0_6, %c0_7] : memref<8x8xf32, #tpu.memory_space<vmem>>, vector<8x8xf32>
    %15 = vector.shape_cast %14 : vector<8x8xf32> to vector<1x8x8xf32>
    %16 = vector.broadcast %15 : vector<1x8x8xf32> to vector<4x8x8xf32>
    %17 = arith.addf %13, %16 : vector<4x8x8xf32>
    %cst_8 = arith.constant dense<0xFF800000> : vector<4x8xf32>
    %18 = vector.multi_reduction <maximumf>, %17, %cst_8 [2] : vector<4x8x8xf32> to vector<4x8xf32>
    %19 = vector.shape_cast %18 : vector<4x8xf32> to vector<4x8x1xf32>
    %20 = vector.broadcast %19 : vector<4x8x1xf32> to vector<4x8x8xf32>
    %21 = arith.subf %17, %20 : vector<4x8x8xf32>
    %22 = math.exp %21 : vector<4x8x8xf32>
    %cst_9 = arith.constant dense<0.000000e+00> : vector<4x8xf32>
    %23 = vector.multi_reduction <add>, %22, %cst_9 [2] : vector<4x8x8xf32> to vector<4x8xf32>
    %24 = vector.shape_cast %23 : vector<4x8xf32> to vector<4x8x1xf32>
    %25 = tpu.reciprocal %24 {approx = true} : vector<4x8x1xf32> -> vector<4x8x1xf32>
    %26 = vector.broadcast %25 : vector<4x8x1xf32> to vector<4x8x8xf32>
    %27 = arith.mulf %22, %26 : vector<4x8x8xf32>
    %28 = arith.truncf %27 : vector<4x8x8xf32> to vector<4x8x8xbf16>
    %29 = arith.truncf %10 : vector<4x8x8xf32> to vector<4x8x8xbf16>
    "tpu.trace_start"() <{level = 10 : i32, message = "bqk,bkd->bqd"}> : () -> ()
    %cst_10 = arith.constant dense<0.000000e+00> : vector<4x8x8xf32>
    %30 = tpu.matmul %28, %29, %cst_10 {dimension_numbers = #tpu.dot_dimension_numbers<[2], [1], [1], [2], [0, 0, 0, 1, 1, 2], [0], [0]>} : vector<4x8x8xbf16>, vector<4x8x8xbf16>, vector<4x8x8xf32> -> vector<4x8x8xf32>
    "tpu.trace_stop"() : () -> ()
    %31 = arith.truncf %30 : vector<4x8x8xf32> to vector<4x8x8xbf16>
    %c0_11 = arith.constant 0 : index
    %c0_12 = arith.constant 0 : index
    %c0_13 = arith.constant 0 : index
    %32 = vector.load %arg4[%c0_11, %c0_12, %c0_13] : memref<4x8x32xbf16, #tpu.memory_space<vmem>>, vector<4x8x32xbf16>
    "tpu.trace_start"() <{level = 10 : i32, message = "hmd,hde->hme"}> : () -> ()
    %cst_14 = arith.constant dense<0.000000e+00> : vector<4x8x32xf32>
    %33 = tpu.matmul %31, %32, %cst_14 {dimension_numbers = #tpu.dot_dimension_numbers<[2], [1], [1], [2], [0, 0, 0, 1, 1, 2], [0], [0]>} : vector<4x8x8xbf16>, vector<4x8x32xbf16>, vector<4x8x32xf32> -> vector<4x8x32xf32>
    "tpu.trace_stop"() : () -> ()
    %cst_15 = arith.constant dense<0.000000e+00> : vector<8x32xf32>
    %34 = vector.multi_reduction <add>, %33, %cst_15 [0] : vector<4x8x32xf32> to vector<8x32xf32>
    %c0_16 = arith.constant 0 : index
    %c0_17 = arith.constant 0 : index
    %35 = vector.load %arg5[%c0_16, %c0_17] : memref<1x32xf32, #tpu.memory_space<vmem>>, vector<1x32xf32>
    %36 = vector.broadcast %35 : vector<1x32xf32> to vector<8x32xf32>
    %37 = arith.addf %34, %36 : vector<8x32xf32>
    %38 = vector.shape_cast %37 : vector<8x32xf32> to vector<1x8x32xf32>
    %c0_18 = arith.constant 0 : index
    %c0_19 = arith.constant 0 : index
    %c0_20 = arith.constant 0 : index
    %39 = vector.load %arg6[%c0_18, %c0_19, %c0_20] : memref<1x8x32xf32, #tpu.memory_space<vmem>>, vector<1x8x32xf32>
    tpu.vector_store %arg6[%c0_18, %c0_19, %c0_20], %38 {strides = array<i32>} : memref<1x8x32xf32, #tpu.memory_space<vmem>>, vector<1x8x32xf32>,
    return
  }
  func.func @transform_0(%arg0: i32) -> (i32, i32, i32) {
    %c0_i32 = arith.constant 0 : i32
    %c0_i32_0 = arith.constant 0 : i32
    %c0_i32_1 = arith.constant 0 : i32
    return %arg0, %c0_i32, %c0_i32_0 : i32, i32, i32
  }
  func.func @transform_1(%arg0: i32) -> (i32, i32, i32) {
    %c0_i32 = arith.constant 0 : i32
    %c0_i32_0 = arith.constant 0 : i32
    %c0_i32_1 = arith.constant 0 : i32
    %c0_i32_2 = arith.constant 0 : i32
    return %c0_i32, %c0_i32_0, %c0_i32_1 : i32, i32, i32
  }
  func.func @transform_2(%arg0: i32) -> (i32, i32) {
    %c0_i32 = arith.constant 0 : i32
    %c0_i32_0 = arith.constant 0 : i32
    %c0_i32_1 = arith.constant 0 : i32
    return %c0_i32, %c0_i32_0 : i32, i32
  }
  func.func @transform_3(%arg0: i32) -> (i32, i32, i32) {
    %c0_i32 = arith.constant 0 : i32
    %c0_i32_0 = arith.constant 0 : i32
    %c0_i32_1 = arith.constant 0 : i32
    %c0_i32_2 = arith.constant 0 : i32
    return %c0_i32, %c0_i32_0, %c0_i32_1 : i32, i32, i32
  }
  func.func @transform_4(%arg0: i32) -> (i32, i32) {
    %c0_i32 = arith.constant 0 : i32
    %c0_i32_0 = arith.constant 0 : i32
    %c0_i32_1 = arith.constant 0 : i32
    return %c0_i32, %c0_i32_0 : i32, i32
  }
  func.func @transform_5(%arg0: i32) -> (i32, i32, i32) {
    %c0_i32 = arith.constant 0 : i32
    %c0_i32_0 = arith.constant 0 : i32
    %c0_i32_1 = arith.constant 0 : i32
    return %arg0, %c0_i32, %c0_i32_0 : i32, i32, i32
  }
}

</mosaic_0001>

<bundles_post_ra>
// kernel: tpu_custom_call.1
= control target key start
LH: loop header
LB: loop body
LE: loop exit
PB: predicated region body
PF: predicated region fallthrough
CT: control target
= control target key end

     0   :  { %10 = vsyncpa [#allocation3], 0  ;;  %s2412_s0 = inlined_call_operand.vmem [shape: f32[2,8,32], index: 0, kind: input, shape index: {}]   ;;  %s2413_s1 = inlined_call_operand.vmem [shape: bf16[12,32,8], index: 1, kind: input, shape index: {}]   ;;  %s2414_s2 = inlined_call_operand.vmem [shape: f32[8,8], index: 2, kind: input, shape index: {}]   ;;  %s2415_s3 = inlined_call_operand.vmem [shape: bf16[4,8,32], index: 3, kind: input, shape index: {}]   ;;  %s2416_s4 = inlined_call_operand.vmem [shape: f32[1,32], index: 4, kind: input, shape index: {}]   ;;  %s2417_s5 = inlined_call_operand.hbm [shape: f32[2,8,32], index: 5, kind: output, shape index: {}]  }
   0x1   :  { %12 = vsyncpa [#allocation3 + $0x1], 0  ;;  %s2074_s18 = smov 0   ;;  %s2076_s19 = smov 0  }
   0x2   :  { %s2078_s20 = smov 0   ;;  %s2080_s21 = smov 0  }
   0x3 LB: > { %s2095_s22 = sadd.s32 4294967295, %s2039_s21   ;;  %s1611_s23 = sadd.s32 4294967294, %s2039_s21   ;;  %s2039_s21 = sphi %s2080_s21, %s2423_s21   ;;  %s2035_s20 = sphi %s2078_s20, %s2422_s20   ;;  %s2031_s19 = sphi %s2076_s19, %s2421_s19   ;;  %s2027_s18 = sphi %s2074_s18, %s2420_s18  }
   0x4   : > { %s2099_s24 = sadd.s32 1, %s2039_s21   ;;  %s135_s25 = sadd.s32 1, %s2035_s20 }
   0x5   : > { %s132_s26 = ssub.s32 %s2039_s21, %s2099_s24  ;;  %p145_p0 = scmp.ne.s32.totalorder %s2035_s20, %s2031_s19 }
   0x6   : > { %p133_p1 = scmp.eq.s32.totalorder %s132_s26, 0  ;;  %p146_p2 = scmp.eq.s32.totalorder %s2095_s22, 1 }
   0x7   : > { %p151_p3 = scmp.ne.s32.totalorder %s2031_s19, %s2027_s18  ;;  %p152_p4 = scmp.eq.s32.totalorder %s1611_s23, 1 }
   0x8   : > { %s2110_s27 = scalar_select %p133_p1, %s2035_s20, %s135_s25  }
   0x9   : > { %p2112_p5 = por %p146_p2, %p145_p0  ;;  %p2116_p6 = por %p152_p4, %p151_p3 }
   0xa   : > { %p1614_p7 = scmp.ge.s32.totalorder %s2039_s21, 1  ;;  %p189_p8 = scmp.lt.s32.totalorder %s2039_s21, 3 }
   0xc   : > { %p190_p9 = pnand %p1614_p7, %p189_p8 }
   0xd   : > { %p216_p10 = scmp.lt.s32.totalorder (!%p190_p9), %s2095_s22, 1  ;;  %s213_s26 = sand.u32 (!%p190_p9), 1, %s2031_s19  }
   0xe   : > { %193 = sbr.rel (%p190_p9) target bundleno = 1174 (0x496), region = 40  ;;  %s1615_s30 = sshll.u32 (!%p190_p9), %s213_s26, 3 }
   0xf   : > { %s1667_s8 = sshll.u32 (!%p190_p9), %s2095_s22, 7  ;;  %s215_s9 = scalar_lea.vmem (!%p190_p9), [#allocation2], %s1615_s30 }
  0x10   : > { %s1552_s10 = sshll.u32 (!%p190_p9), %s215_s9, 4  ;;  %s1553_s10 = int_to_ptr.vmem [resolvable:$true] %s1552_s10 }
  0x11   : > { %s1979_s15 = scalar_lea.vmem (!%p190_p9), %s1553_s10, 128 }
  0x12   : > { %p1980_p11 = scmp.ne.s32.totalorder (!%p190_p9), %s1553_s10, %s1979_s15 }
  0x13   : > { %v1939_v0 = vld [vmem:[%s2413_s1 + $0x8] sm:$0xff]   ;;  %v2041_v1 = vmov 0.0   ;;  %v1940_v2 = vld [vmem:[%s2413_s1 + $0x18] sm:$0xff]   ;;  %v1941_v3 = vld [vmem:[%s2413_s1] sm:$0xff]   ;;  %vm2042_vm0 = vmmov 0   ;;  %s217_s13 = scalar_select %p216_p10, %s2095_s22, 1 }
  0x14   : > { %1730 = vmatprep.subr.bf16.mxu0 %v2041_v1  ;;  %1738 = vmatprep.subr.bf16.mxu1 %v2041_v1  ;;  %v1942_v4 = vld [vmem:[%s2413_s1 + $0x10] sm:$0xff]   ;;  %v1943_v5 = vld [vmem:[%s2413_s1 + $0x28] sm:$0xff]   ;;  %v1944_v6 = vld [vmem:[%s2413_s1 + $0x38] sm:$0xff]   ;;  %vm283_vm1 = vcmask 261120   ;;  %vm908_vm2 = vcmask 64512   ;;  %vm1148_vm3 = vcmask 1043456   ;;  %p1981_p12 = pnand %p1980_p11, %p2112_p5 }
  0x15   : > { %1731 = vmatpush3.bf16.msra.mxu0 %v1939_v0  ;;  %1734 = vmatprep.mubr.msk.bf16.mxu0 %vm2042_vm0, %v2041_v1  ;;  %s1616_s14 = sshll.u32 %s217_s13, 3  ;;  %v1945_v9 = vld [vmem:[%s2413_s1 + $0x20] sm:$0xff]   ;;  %v1946_v10 = vld [vmem:[%s2413_s1 + $0x30] sm:$0xff]   ;;  %v1947_v11 = vld [vmem:[%s2413_s1 + $0x48] sm:$0xff]   ;;  %s2376_s13 = scalar_lea.hbm %s2417_s5, %s1667_s8 }
  0x16   : > { %1739 = vmatpush3.bf16.msra.mxu1 %v1940_v2  ;;  %1732 = vmatprep.subr.bf16.mxu0 %v2041_v1  ;;  %s219_s25 = scalar_lea.vmem %s2412_s0, %s1616_s14  ;;  %v1948_v12 = vld [vmem:[%s2413_s1 + $0x58] sm:$0xff]   ;;  %v1949_v13 = vld [vmem:[%s2413_s1 + $0x40] sm:$0xff]   ;;  %v1950_v14 = vld [vmem:[%s2413_s1 + $0x50] sm:$0xff]   ;;  %s1539_s14 = scalar_lea.sflag [#allocation3], %s213_s26 }
  0x17   : > { %1740 = vmatprep.subr.bf16.mxu1 %v2041_v1  ;;  %1742 = vmatprep.mubr.msk.bf16.mxu1 %vm2042_vm0, %v2041_v1  ;;  %v221_v7 = vld [vmem:[%s219_s25] sm:$0xff]  ;;  %v1951_v15 = vld [vmem:[%s2413_s1 + $0x68] sm:$0xff]   ;;  %v1952_v16 = vld [vmem:[%s2413_s1 + $0x78] sm:$0xff]   ;;  %p1982_p13 = pneg %p1981_p12  ;;  %s2043_s22 = smov [#allocation2]  }
  0x18   : > { %v2155_v8 = vpack.c.bf16 %v221_v7, %v221_v7  ;;  %v1953_v17 = vld [vmem:[%s2413_s1 + $0x60] sm:$0xff]   ;;  %v1954_v18 = vld [vmem:[%s2413_s1 + $0x70] sm:$0xff]   ;;  %v1955_v19 = vld [vmem:[%s2413_s1 + $0x88] sm:$0xff]   ;;  %s1983_s16 = sshll.u32 %s2043_s22, 4  ;;  %s1984_s16 = int_to_ptr.vmem [resolvable:$false] %s1983_s16 }
  0x19   : > { %1733 = vmatpush3.bf16.msra.mxu0 %v1941_v3  ;;  %v1956_v20 = vld [vmem:[%s2413_s1 + $0x80] sm:$0xff]   ;;  %v1957_v21 = vld [vmem:[%s2413_s1 + $0x98] sm:$0xff]   ;;  %v1958_v22 = vld [vmem:[%s2413_s1 + $0x90] sm:$0xff]   ;;  %s1985_s17 = scalar_lea.vmem %s1984_s16, 256  ;;  %p1986_p0 = scmp.lt.s32.totalorder %s1553_s10, %s1984_s16 }
  0x1a   : > { %1741 = vmatpush3.bf16.msra.mxu1 %v1942_v4  ;;  %1746 = vmatprep.subr.bf16.mxu0 %v2041_v1  ;;  %v1959_v23 = vld [vmem:[%s2413_s1 + $0xa8] sm:$0xff]   ;;  %v1960_v24 = vld [vmem:[%s2413_s1 + $0xa0] sm:$0xff]   ;;  %v1961_v25 = vld [vmem:[%s2413_s1 + $0xb8] sm:$0xff]   ;;  %p1987_p1 = scmp.lt.s32.totalorder %s1985_s17, %s1979_s15 }
  0x1b   : > { %1754 = vmatprep.subr.bf16.mxu1 %v2041_v1  ;;  %v1962_v26 = vld [vmem:[%s2413_s1 + $0xb0] sm:$0xff]  }
  0x1c   : > { %1735 = vmatmul.mubr.msk.bf16.vlgmr.msra.gmra.mxu0 %vm283_vm1, %v2155_v8  ;;  %p1988_p2 = por %p1987_p1, %p1986_p0 }
  0x1d   : > { %1743 = vmatmul.mubr.msk.bf16.vlgmr.msra.gmra.mxu1 %vm283_vm1, %v2155_v8  ;;  %1747 = vmatpush3.bf16.msra.mxu0 %v1943_v5 }
  0x1e   : > { %1755 = vmatpush3.bf16.msra.mxu1 %v1944_v6  ;;  %1748 = vmatprep.subr.bf16.mxu0 %v2041_v1  ;;  %p1989_p3 = pnand %p1988_p2, %p1982_p13 }
  0x1f   : > { %1756 = vmatprep.subr.bf16.mxu1 %v2041_v1  ;;  %1750 = vmatprep.mubr.msk.bf16.mxu0 %vm2042_vm0, %v2041_v1 }
  0x20   : > { %1758 = vmatprep.mubr.msk.bf16.mxu1 %vm2042_vm0, %v2041_v1 }
  0x21   : > { %1749 = vmatpush3.bf16.msra.mxu0 %v1945_v9 }
  0x22   : > { %1757 = vmatpush3.bf16.msra.mxu1 %v1946_v10  ;;  %1762 = vmatprep.subr.bf16.mxu0 %v2041_v1 }
  0x23   : > { %1770 = vmatprep.subr.bf16.mxu1 %v2041_v1 }
  0x24   : > { %1751 = vmatmul.mubr.msk.bf16.vlgmr.msra.gmra.mxu0 %vm283_vm1, %v2155_v8 }
  0x25   : > { %1759 = vmatmul.mubr.msk.bf16.vlgmr.msra.gmra.mxu1 %vm283_vm1, %v2155_v8  ;;  %1763 = vmatpush3.bf16.msra.mxu0 %v1947_v11 }
  0x26   : > { %1771 = vmatpush3.bf16.msra.mxu1 %v1948_v12  ;;  %1764 = vmatprep.subr.bf16.mxu0 %v2041_v1 }
  0x27   : > { %1772 = vmatprep.subr.bf16.mxu1 %v2041_v1  ;;  %1766 = vmatprep.mubr.msk.bf16.mxu0 %vm2042_vm0, %v2041_v1 }
  0x28   : > { %1774 = vmatprep.mubr.msk.bf16.mxu1 %vm2042_vm0, %v2041_v1 }
  0x29   : > { %1765 = vmatpush3.bf16.msra.mxu0 %v1949_v13 }
  0x2a   : > { %1773 = vmatpush3.bf16.msra.mxu1 %v1950_v14  ;;  %1778 = vmatprep.subr.bf16.mxu0 %v2041_v1 }
  0x2b   : > { %1786 = vmatprep.subr.bf16.mxu1 %v2041_v1 }
  0x2c   : > { %1767 = vmatmul.mubr.msk.bf16.vlgmr.msra.gmra.mxu0 %vm283_vm1, %v2155_v8 }
  0x2d   : > { %1775 = vmatmul.mubr.msk.bf16.vlgmr.msra.gmra.mxu1 %vm283_vm1, %v2155_v8  ;;  %1779 = vmatpush3.bf16.msra.mxu0 %v1951_v15 }
  0x2e   : > { %1787 = vmatpush3.bf16.msra.mxu1 %v1952_v16  ;;  %1780 = vmatprep.subr.bf16.mxu0 %v2041_v1 }
  0x2f   : > { %1788 = vmatprep.subr.bf16.mxu1 %v2041_v1  ;;  %1782 = vmatprep.mubr.msk.bf16.mxu0 %vm2042_vm0, %v2041_v1 }
  0x30   : > { %1790 = vmatprep.mubr.msk.bf16.mxu1 %vm2042_vm0, %v2041_v1 }
  0x31   : > { %1781 = vmatpush3.bf16.msra.mxu0 %v1953_v17 }
  0x32   : > { %1789 = vmatpush3.bf16.msra.mxu1 %v1954_v18  ;;  %1794 = vmatprep.subr.bf16.mxu0 %v2041_v1 }
  0x33   : > { %1802 = vmatprep.subr.bf16.mxu1 %v2041_v1 }
  0x34   : > { %1783 = vmatmul.mubr.msk.bf16.vlgmr.msra.gmra.mxu0 %vm283_vm1, %v2155_v8 }
  0x35   : > { %1791 = vmatmul.mubr.msk.bf16.vlgmr.msra.gmra.mxu1 %vm283_vm1, %v2155_v8  ;;  %1795 = vmatpush3.bf16.msra.mxu0 %v1955_v19 }
  0x36   : > { %1798 = vmatprep.mubr.msk.bf16.mxu0 %vm2042_vm0, %v2041_v1  ;;  %1796 = vmatprep.subr.bf16.mxu0 %v2041_v1 }
  0x37   : > { %1806 = vmatprep.mubr.msk.bf16.mxu1 %vm2042_vm0, %v2041_v1  ;;  %1803 = vmatpush3.bf16.msra.mxu1 %v1957_v21 }
  0x38   : > { %1804 = vmatprep.subr.bf16.mxu1 %v2041_v1 }
  0x39   : > { %1797 = vmatpush3.bf16.msra.mxu0 %v1956_v20 }
  0x3a   : > { %1810 = vmatprep.subr.bf16.mxu0 %v2041_v1 }
  0x3b   : > { %1805 = vmatpush3.bf16.msra.mxu1 %v1958_v22 }
  0x3c   : > { %1799 = vmatmul.mubr.msk.bf16.vlgmr.msra.gmra.mxu0 %vm283_vm1, %v2155_v8  ;;  %1818 = vmatprep.subr.bf16.mxu1 %v2041_v1 }
  0x3d   : > { %1811 = vmatpush3.bf16.msra.mxu0 %v1959_v23  ;;  %1814 = vmatprep.mubr.msk.bf16.mxu0 %vm2042_vm0, %v2041_v1 }
  0x3e   : > { %1812 = vmatprep.subr.bf16.mxu0 %v2041_v1  ;;  %1807 = vmatmul.mubr.msk.bf16.vlgmr.msra.gmra.mxu1 %vm283_vm1, %v2155_v8 }
  0x3f   : > { %1819 = vmatpush3.bf16.msra.mxu1 %v1961_v25  ;;  %1822 = vmatprep.mubr.msk.bf16.mxu1 %vm2042_vm0, %v2041_v1 }
  0x40   : > { %1820 = vmatprep.subr.bf16.mxu1 %v2041_v1 }
  0x41   : > { %1813 = vmatpush3.bf16.msra.mxu0 %v1960_v24 }
  0x42   : > { %1826 = vmatprep.subr.bf16.mxu0 %v2041_v1 }
  0x43   : > { %1821 = vmatpush3.bf16.msra.mxu1 %v1962_v26 }
  0x44   : > { %1815 = vmatmul.mubr.msk.bf16.vlgmr.msra.gmra.mxu0 %vm283_vm1, %v2155_v8  ;;  %1832 = vmatprep.subr.bf16.mxu1 %v2041_v1 }
  0x45   : > { %1828 = vmatprep.mubr.msk.bf16.mxu0 %vm2042_vm0, %v2041_v1 }
  0x46   : > { %1823 = vmatmul.mubr.msk.bf16.vlgmr.msra.gmra.mxu1 %vm283_vm1, %v2155_v8 }
  0x47   : > { %1834 = vmatprep.mubr.msk.bf16.mxu1 %vm2042_vm0, %v2041_v1 }
  0xdc   : > { %v321_v27 = vpop.f32.mrf.mxu0 }
  0xdd   : > { %v373_v28 = vpop.f32.mrf.mxu1  ;;  %v899_v57 = vpack.c.bf16 %v321_v27, %v321_v27 }
  0xde   : > { %v1736_v29 = vpop.f32.mrf.mxu0  ;;  %v900_v58 = vpack.c.bf16 %v373_v28, %v373_v28  ;;  %v907_v28 = vld [vmem:[%s2414_s2] sm:$0xff] }
  0xdf   : > { %v1744_v30 = vpop.f32.mrf.mxu1 }
  0xe0   : > { %v324_v31 = vpop.f32.mrf.mxu0 }
  0xe1   : > { %v376_v32 = vpop.f32.mrf.mxu1 }
  0xe2   : > { %v1737_v33 = vpop.f32.mrf.mxu0 }
  0xe3   : > { %v1745_v34 = vpop.f32.mrf.mxu1 }
  0xe4   : > { %v425_v35 = vpop.f32.mrf.mxu0 }
  0xe5   : > { %v477_v36 = vpop.f32.mrf.mxu1  ;;  %v901_v6 = vpack.c.bf16 %v425_v35, %v425_v35 }
  0xe6   : > { %v1752_v37 = vpop.f32.mrf.mxu0  ;;  %v902_v7 = vpack.c.bf16 %v477_v36, %v477_v36 }
  0xe7   : > { %v1760_v38 = vpop.f32.mrf.mxu1 }
  0xe8   : > { %v428_v39 = vpop.f32.mrf.mxu0 }
  0xe9   : > { %v480_v40 = vpop.f32.mrf.mxu1 }
  0xea   : > { %v1753_v41 = vpop.f32.mrf.mxu0 }
  0xeb   : > { %v1761_v42 = vpop.f32.mrf.mxu1 }
  0xec   : > { %v529_v43 = vpop.f32.mrf.mxu0 }
  0xed   : > { %v581_v44 = vpop.f32.mrf.mxu1  ;;  %v903_v45 = vpack.c.bf16 %v529_v43, %v529_v43 }
  0xee   : > { %v904_v46 = vpack.c.bf16 %v581_v44, %v581_v44  ;;  %v1768_v47 = vpop.f32.mrf.mxu0 }
  0xef   : > { %v1776_v48 = vpop.f32.mrf.mxu1  ;;  %v913_v49 = vsel %vm908_vm2, %v903_v45, 0 }
  0xf0   : > { %v959_v50 = vsel %vm908_vm2, %v904_v46, 0  ;;  %v532_v51 = vpop.f32.mrf.mxu0  ;;  %1827 = vmatpush3.bf16.xpose.msra.mxu0 %v913_v49 }
  0xf1   : > { %v584_v52 = vpop.f32.mrf.mxu1  ;;  %1833 = vmatpush3.bf16.xpose.msra.mxu1 %v959_v50  ;;  %1838 = vmatprep.subr.bf16.mxu0 %v2041_v1 }
  0xf2   : > { %1844 = vmatprep.subr.bf16.mxu1 %v2041_v1  ;;  %v1769_v53 = vpop.f32.mrf.mxu0 }
  0xf3   : > { %v1777_v54 = vpop.f32.mrf.mxu1 }
  0xf4   : > { %v633_v55 = vpop.f32.mrf.mxu0 }
  0xf5   : > { %v685_v56 = vpop.f32.mrf.mxu1  ;;  %v905_v59 = vpack.c.bf16 %v633_v55, %v633_v55 }
  0xf6   : > { %v906_v60 = vpack.c.bf16 %v685_v56, %v685_v56  ;;  %v1784_v61 = vpop.f32.mrf.mxu0 }
  0xf7   : > { %v1792_v62 = vpop.f32.mrf.mxu1  ;;  %v1005_v63 = vsel %vm908_vm2, %v905_v59, 0  ;;  %1829 = vmatmul.mubr.msk.bf16.vlgmr.msra.gmra.mxu0 %vm908_vm2, %v899_v57 }
  0xf8   : > { %v1051_v0 = vsel %vm908_vm2, %v906_v60, 0  ;;  %1835 = vmatmul.mubr.msk.bf16.vlgmr.msra.gmra.mxu1 %vm908_vm2, %v900_v58  ;;  %v636_v2 = vpop.f32.mrf.mxu0  ;;  %1839 = vmatpush3.bf16.xpose.msra.mxu0 %v1005_v63 }
  0xf9   : > { %v688_v3 = vpop.f32.mrf.mxu1  ;;  %1845 = vmatpush3.bf16.xpose.msra.mxu1 %v1051_v0  ;;  %1840 = vmatprep.mubr.msk.bf16.mxu0 %vm2042_vm0, %v2041_v1 }
  0xfa   : > { %1846 = vmatprep.mubr.msk.bf16.mxu1 %vm2042_vm0, %v2041_v1  ;;  %v1785_v4 = vpop.f32.mrf.mxu0  ;;  %1850 = vmatprep.subr.bf16.mxu0 %v2041_v1 }
  0xfb   : > { %v1793_v5 = vpop.f32.mrf.mxu1  ;;  %1856 = vmatprep.subr.bf16.mxu1 %v2041_v1 }
  0xfc   : > { %v737_v8 = vpop.f32.mrf.mxu0 }
  0xfd   : > { %v1141_v9 = vpack.c.bf16 %v737_v8, %v737_v8 }
  0xfe   : > { %v1800_v10 = vpop.f32.mrf.mxu0  ;;  %v789_v13 = vpop.f32.mrf.mxu1 }
  0xff   : > { %1841 = vmatmul.mubr.msk.bf16.vlgmr.msra.gmra.mxu0 %vm908_vm2, %v901_v6  ;;  %v1150_v11 = vsel %vm1148_vm3, %v1141_v9, 0  ;;  %v1142_v14 = vpack.c.bf16 %v789_v13, %v789_v13 }
 0x100   : > { %1847 = vmatmul.mubr.msk.bf16.vlgmr.msra.gmra.mxu1 %vm908_vm2, %v902_v7  ;;  %1852 = vmatprep.mubr.msk.bf16.mxu0 %vm2042_vm0, %v2041_v1  ;;  %v740_v12 = vpop.f32.mrf.mxu0  ;;  %v1808_v16 = vpop.f32.mrf.mxu1 }
 0x101   : > { %1858 = vmatprep.mubr.msk.bf16.mxu1 %vm2042_vm0, %v2041_v1  ;;  %1851 = vmatpush3.bf16.msra.mxu0 %v1150_v11  ;;  %v1196_v17 = vsel %vm1148_vm3, %v1142_v14, 0 }
 0x102   : > { %1862 = vmatprep.subr.bf16.mxu0 %v2041_v1  ;;  %v1801_v15 = vpop.f32.mrf.mxu0  ;;  %v792_v18 = vpop.f32.mrf.mxu1  ;;  %1857 = vmatpush3.bf16.msra.mxu1 %v1196_v17 }
 0x103   : > { %1868 = vmatprep.subr.bf16.mxu1 %v2041_v1 }
 0x104   : > { %v2302_v19 = vpop.f32.mrf.mxu0  ;;  %v1809_v20 = vpop.f32.mrf.mxu1 }
 0x105   : > { %v1143_v15 = vpack.c.bf16 %v2302_v19, %v2302_v19  ;;  %v1334_v19 = vld [vmem:[%s2415_s3] sm:$0xf] }
 0x106   : > { %v1816_v21 = vpop.f32.mrf.mxu0  ;;  %v2305_v23 = vpop.f32.mrf.mxu1 }
 0x107   : > { %v1242_v20 = vsel %vm1148_vm3, %v1143_v15, 0  ;;  %v1144_v21 = vpack.c.bf16 %v2305_v23, %v2305_v23 }
 0x108   : > { %v844_v22 = vpop.f32.mrf.mxu0  ;;  %v1824_v25 = vpop.f32.mrf.mxu1 }
 0x10a   : > { %v1817_v24 = vpop.f32.mrf.mxu0  ;;  %v896_v26 = vpop.f32.mrf.mxu1 }
 0x10b   : > { %v1288_v26 = vsel %vm1148_vm3, %v1144_v21, 0 }
 0x10c   : > { %v1825_v27 = vpop.f32.mrf.mxu1 }
 0x1b7   : > { %v949_v29 = vpop.f32.mrf.mxu0 }
 0x1b8   : > { %v995_v30 = vpop.f32.mrf.mxu1  ;;  %v950_v31 = vadd.f32 %v949_v29, %v907_v28 }
 0x1b9   : > { %v1830_v32 = vpop.f32.mrf.mxu0  ;;  %v996_v34 = vadd.f32 %v995_v30, %v907_v28 }
 0x1ba   : > { %v1836_v33 = vpop.f32.mrf.mxu1  ;;  %v1093_v35 = vsel %vm908_vm2, %v950_v31, -inf  ;;  %v1335_v32 = vld [vmem:[%s2415_s3 + $0x4] sm:$0xf] }
 0x1bb   : > { %1094 = vmax.xlane.f32.xlu0 %v1093_v35  ;;  %v952_v37 = vpop.f32.mrf.mxu0  ;;  %v1096_v40 = vsel %vm908_vm2, %v996_v34, -inf  ;;  %v1388_v33 = vsel %vm1148_vm3, %v1335_v32, 0 }
 0x1bc   : > { %v998_v36 = vpop.f32.mrf.mxu1 }
 0x1bd   : > { %v1831_v38 = vpop.f32.mrf.mxu0 }
 0x1be   : > { %v1837_v39 = vpop.f32.mrf.mxu1 }
 0x1bf   : > { %1097 = vmax.xlane.f32.xlu0 %v1096_v40  ;;  %v1041_v42 = vpop.f32.mrf.mxu0  ;;  %v1337_v39 = vld [vmem:[%s2415_s3 + $0xc] sm:$0xf] }
 0x1c0   : > { %v1087_v41 = vpop.f32.mrf.mxu1  ;;  %v1042_v43 = vadd.f32 %v1041_v42, %v907_v28 }
 0x1c1   : > { %v1842_v44 = vpop.f32.mrf.mxu0  ;;  %v1088_v46 = vadd.f32 %v1087_v41, %v907_v28  ;;  %v1342_v28 = vsel %vm1148_vm3, %v1334_v19, 0 }
 0x1c2   : > { %v1848_v45 = vpop.f32.mrf.mxu1  ;;  %v1099_v47 = vsel %vm908_vm2, %v1042_v43, -inf }
 0x1c3   : > { %1100 = vmax.xlane.f32.xlu1 %v1099_v47  ;;  %v1044_v49 = vpop.f32.mrf.mxu0  ;;  %v1102_v52 = vsel %vm908_vm2, %v1088_v46, -inf }
 0x1c4   : > { %v1090_v48 = vpop.f32.mrf.mxu1 }
 0x1c5   : > { %v1843_v50 = vpop.f32.mrf.mxu0 }
 0x1c6   : > { %v1849_v51 = vpop.f32.mrf.mxu1 }
 0x1c7   : > { %1103 = vmax.xlane.f32.xlu1 %v1102_v52 }
 0x244   : > { %v1095_v53 = vpop.xlane.xlu0 %1094 }
 0x245   : > { %v1105_v54 = vsub.f32 %v950_v31, %v1095_v53 }
 0x247   : > { %v1109_v55 = vmul.f32 1.442695, %v1105_v54 }
 0x248   : > { %v1098_v56 = vpop.xlane.xlu0 %1097 }
 0x249   : > { %1963 = vpow2.f32 %v1109_v55  ;;  %v1106_v57 = vsub.f32 %v996_v34, %v1098_v56  ;;  %v1336_v34 = vld [vmem:[%s2415_s3 + $0x8] sm:$0xf] }
 0x24a   : > { %v1434_v37 = vsel %vm1148_vm3, %v1336_v34, 0 }
 0x24b   : > { %v1111_v58 = vmul.f32 1.442695, %v1106_v57 }
 0x24c   : > { %v1101_v59 = vpop.xlane.xlu1 %1100 }
 0x24d   : > { %1965 = vpow2.f32 %v1111_v58  ;;  %v1107_v60 = vsub.f32 %v1042_v43, %v1101_v59  ;;  %v1480_v43 = vsel %vm1148_vm3, %v1337_v39, 0 }
 0x24f   : > { %v1113_v61 = vmul.f32 1.442695, %v1107_v60 }
 0x250   : > { %v1104_v62 = vpop.xlane.xlu1 %1103 }
 0x251   : > { %1967 = vpow2.f32 %v1113_v61  ;;  %v1108_v63 = vsub.f32 %v1088_v46, %v1104_v62 }
 0x253   : > { %v1115_v0 = vmul.f32 1.442695, %v1108_v63 }
 0x255   : > { %1969 = vpow2.f32 %v1115_v0 }
 0x256   : > { %v1964_v2 = vpop.eup %1963 }
 0x257   : > { %v1117_v3 = vsel %vm908_vm2, %v1964_v2, 0.0 }
 0x258   : > { %1118 = vadd.xlane.f32.xlu0 %v1117_v3 }
 0x25a   : > { %v1966_v4 = vpop.eup %1965 }
 0x25b   : > { %v1120_v5 = vsel %vm908_vm2, %v1966_v4, 0.0 }
 0x25c   : > { %1121 = vadd.xlane.f32.xlu1 %v1120_v5 }
 0x25e   : > { %v1968_v6 = vpop.eup %1967 }
 0x25f   : > { %v1123_v7 = vsel %vm908_vm2, %v1968_v6, 0.0 }
 0x260   : > { %1124 = vadd.xlane.f32.xlu0 %v1123_v7 }
 0x262   : > { %v1970_v8 = vpop.eup %1969 }
 0x263   : > { %v1126_v9 = vsel %vm908_vm2, %v1970_v8, 0.0 }
 0x264   : > { %1127 = vadd.xlane.f32.xlu1 %v1126_v9 }
 0x2e1   : > { %v1119_v10 = vpop.xlane.xlu0 %1118 }
 0x2e2   : > { %1971 = vrcp.f32 %v1119_v10 }
 0x2e5   : > { %v1122_v11 = vpop.xlane.xlu1 %1121 }
 0x2e6   : > { %1973 = vrcp.f32 %v1122_v11 }
 0x2e9   : > { %v1125_v12 = vpop.xlane.xlu0 %1124 }
 0x2ea   : > { %1975 = vrcp.f32 %v1125_v12  ;;  %v1665_v12 = vld [vmem:[%s2416_s4] ss:$0 sm:$0xff] }
 0x2ed   : > { %v1128_v13 = vpop.xlane.xlu1 %1127 }
 0x2ee   : > { %1977 = vrcp.f32 %v1128_v13 }
 0x2ef   : > { %v1972_v14 = vpop.eup %1971 }
 0x2f0   : > { %v1133_v16 = vmul.f32 %v1972_v14, %v1964_v2 }
 0x2f2   : > { %v1137_v17 = vpack.c.bf16 %v1133_v16, %v1133_v16 }
 0x2f3   : > { %v1974_v18 = vpop.eup %1973 }
 0x2f4   : > { %1853 = vmatmul.mubr.msk.bf16.vlgmr.msra.gmra.mxu0 %vm908_vm2, %v1137_v17  ;;  %v1134_v22 = vmul.f32 %v1974_v18, %v1966_v4 }
 0x2f5   : > { %1863 = vmatpush3.bf16.msra.mxu0 %v1242_v20  ;;  %1864 = vmatprep.mubr.msk.bf16.mxu0 %vm2042_vm0, %v2041_v1 }
 0x2f6   : > { %v1138_v24 = vpack.c.bf16 %v1134_v22, %v1134_v22  ;;  %1874 = vmatprep.subr.bf16.mxu0 %v2041_v1 }
 0x2f7   : > { %v1976_v25 = vpop.eup %1975 }
 0x2f8   : > { %1859 = vmatmul.mubr.msk.bf16.vlgmr.msra.gmra.mxu1 %vm908_vm2, %v1138_v24  ;;  %v1135_v23 = vmul.f32 %v1976_v25, %v1968_v6 }
 0x2f9   : > { %1869 = vmatpush3.bf16.msra.mxu1 %v1288_v26  ;;  %1870 = vmatprep.mubr.msk.bf16.mxu1 %vm2042_vm0, %v2041_v1 }
 0x2fa   : > { %v1139_v27 = vpack.c.bf16 %v1135_v23, %v1135_v23  ;;  %1880 = vmatprep.subr.bf16.mxu1 %v2041_v1 }
 0x2fb   : > { %v1978_v29 = vpop.eup %1977 }
 0x2fc   : > { %1865 = vmatmul.mubr.msk.bf16.vlgmr.msra.gmra.mxu0 %vm908_vm2, %v1139_v27  ;;  %v1136_v30 = vmul.f32 %v1978_v29, %v1970_v8 }
 0x2fd   : > { %1875 = vmatpush3.bf16.msra.mxu0 %v1342_v28  ;;  %1876 = vmatprep.mubr.msk.bf16.mxu0 %vm2042_vm0, %v2041_v1 }
 0x2fe   : > { %v1140_v31 = vpack.c.bf16 %v1136_v30, %v1136_v30  ;;  %1886 = vmatprep.subr.bf16.mxu0 %v2041_v1 }
 0x300   : > { %1871 = vmatmul.mubr.msk.bf16.vlgmr.msra.gmra.mxu1 %vm908_vm2, %v1140_v31 }
 0x301   : > { %1882 = vmatprep.mubr.msk.bf16.mxu1 %vm2042_vm0, %v2041_v1  ;;  %1881 = vmatpush3.bf16.msra.mxu1 %v1388_v33 }
 0x302   : > { %1892 = vmatprep.subr.bf16.mxu1 %v2041_v1 }
 0x3b4   : > { %v1186_v35 = vpop.f32.mrf.mxu0 }
 0x3b5   : > { %v1330_v36 = vpack.c.bf16 %v1186_v35, %v1186_v35 }
 0x3b6   : > { %v1854_v38 = vpop.f32.mrf.mxu0 }
 0x3b7   : > { %1877 = vmatmul.mubr.msk.bf16.vlgmr.msra.gmra.mxu0 %vm908_vm2, %v1330_v36 }
 0x3b8   : > { %v1189_v40 = vpop.f32.mrf.mxu0  ;;  %v1232_v41 = vpop.f32.mrf.mxu1  ;;  %1887 = vmatpush3.bf16.msra.mxu0 %v1434_v37  ;;  %1888 = vmatprep.mubr.msk.bf16.mxu0 %vm2042_vm0, %v2041_v1 }
 0x3b9   : > { %v1331_v42 = vpack.c.bf16 %v1232_v41, %v1232_v41 }
 0x3ba   : > { %v1855_v44 = vpop.f32.mrf.mxu0  ;;  %v1860_v45 = vpop.f32.mrf.mxu1 }
 0x3bb   : > { %1883 = vmatmul.mubr.msk.bf16.vlgmr.msra.gmra.mxu1 %vm908_vm2, %v1331_v42 }
 0x3bc   : > { %v1235_v46 = vpop.f32.mrf.mxu1  ;;  %v1278_v47 = vpop.f32.mrf.mxu0  ;;  %1893 = vmatpush3.bf16.msra.mxu1 %v1480_v43  ;;  %1894 = vmatprep.mubr.msk.bf16.mxu1 %vm2042_vm0, %v2041_v1 }
 0x3bd   : > { %v1332_v48 = vpack.c.bf16 %v1278_v47, %v1278_v47 }
 0x3be   : > { %v1861_v49 = vpop.f32.mrf.mxu1  ;;  %v1866_v50 = vpop.f32.mrf.mxu0 }
 0x3bf   : > { %1889 = vmatmul.mubr.msk.bf16.vlgmr.msra.gmra.mxu0 %vm908_vm2, %v1332_v48 }
 0x3c0   : > { %v1281_v51 = vpop.f32.mrf.mxu0  ;;  %v1324_v52 = vpop.f32.mrf.mxu1 }
 0x3c1   : > { %v1333_v53 = vpack.c.bf16 %v1324_v52, %v1324_v52 }
 0x3c2   : > { %v1867_v54 = vpop.f32.mrf.mxu0  ;;  %v1872_v55 = vpop.f32.mrf.mxu1 }
 0x3c3   : > { %1895 = vmatmul.mubr.msk.bf16.vlgmr.msra.gmra.mxu1 %vm908_vm2, %v1333_v53 }
 0x3c4   : > { %v1327_v56 = vpop.f32.mrf.mxu1 }
 0x3c6   : > { %v1873_v57 = vpop.f32.mrf.mxu1 }
 0x477   : > { %v1378_v58 = vpop.f32.mrf.mxu0 }
 0x478   : > { %v1522_v3 = vsel %vm283_vm1, %v1378_v58, 0.0 }
 0x479   : > { %v1878_v59 = vpop.f32.mrf.mxu0 }
 0x47b   : > { %v1381_v60 = vpop.f32.mrf.mxu0  ;;  %v1424_v61 = vpop.f32.mrf.mxu1 }
 0x47c   : > { %v1523_v63 = vsel %vm283_vm1, %v1424_v61, 0.0 }
 0x47d   : > { %v1879_v1 = vpop.f32.mrf.mxu0  ;;  %v1884_v62 = vpop.f32.mrf.mxu1  ;;  %v1524_v5 = vadd.f32 %v1523_v63, %v1522_v3 }
 0x47f   : > { %v1427_v0 = vpop.f32.mrf.mxu1  ;;  %v1470_v2 = vpop.f32.mrf.mxu0 }
 0x480   : > { %v1525_v4 = vsel %vm283_vm1, %v1470_v2, 0.0 }
 0x481   : > { %v1885_v6 = vpop.f32.mrf.mxu1  ;;  %v1890_v7 = vpop.f32.mrf.mxu0  ;;  %v1526_v8 = vadd.f32 %v1525_v4, %v1524_v5 }
 0x483   : > { %v1473_v9 = vpop.f32.mrf.mxu0  ;;  %v1516_v10 = vpop.f32.mrf.mxu1 }
 0x484   : > { %v1527_v11 = vsel %vm283_vm1, %v1516_v10, 0.0 }
 0x485   : > { %v1528_v13 = vadd.f32 %v1527_v11, %v1526_v8  ;;  %v1891_v14 = vpop.f32.mrf.mxu0  ;;  %v1896_v15 = vpop.f32.mrf.mxu1 }
 0x487   : > { %v1536_v16 = vadd.f32 %v1665_v12, %v1528_v13  ;;  %v1519_v17 = vpop.f32.mrf.mxu1 }
 0x489   : > { %v1897_v18 = vpop.f32.mrf.mxu1  ;;  %1537 = vst.msk [vmem:[%s215_s9] sm:$0xff] %vm283_vm1, %v1536_v16 }
 0x48a   : > { %1992 = shalt.err (!%p1989_p3)
}
 0x48b   : > { %s1993_s23 = scalar_lea.hbm %s2376_s13, 128  ;;  %s1997_s30 = scalar_lea.hbm %s2417_s5, 256 }
 0x48c   : > { %p1994_p4 = scmp.ne.s32.totalorder %s2376_s13, %s1993_s23  ;;  %p1998_p9 = scmp.lt.s32.totalorder %s2376_s13, %s2417_s5 }
 0x48d   : > { %p1999_p10 = scmp.lt.s32.totalorder %s1997_s30, %s1993_s23 }
 0x48e   : > { %p1995_p7 = pnand %p1994_p4, %p2112_p5 }
 0x48f   : > { %p2000_p11 = por %p1999_p10, %p1998_p9 }
 0x490   : > { %p1996_p8 = pneg %p1995_p7 }
 0x492   : > { %p2001_p12 = pnand %p2000_p11, %p1996_p8 }
 0x494   : > { %2004 = shalt.err (!%p2001_p12)
}
 0x495   : > { %1898 = dma.vmem_to_hbm [thread:$0]  (%p2112_p5), %s1553_s10, 128, %s2376_s13, %s1539_s14  }
 0x496 PF: > { %p1904_p13 = scmp.ge.s32.totalorder %s2039_s21, 2  ;;  %s1564_s8 = sand.u32 1, %s2027_s18  }
 0x497   : > { %s1565_s9 = scalar_lea.sflag [#allocation3], %s1564_s8 }
 0x498   : > { %p1901_p0 = pnand %p1904_p13, %p2116_p6 }
 0x49a   : > { %p1902_p1 = pneg %p1901_p0 }
 0x49c   : > { %2022 = dma.done.wait (%p1902_p1), %s1565_s9, 128  }
 0x49d   : > { %2024 = vsyncadd (%p1902_p1), %s1565_s9, 4294967168  ;;  %p15_p2 = scmp.ge.s32.totalorder %s2099_s24, 4   ;;  %s2420_s18 = smov %s2031_s19 }
 0x49e   : > { %s2421_s19 = smov %s2035_s20  ;;  %s2422_s20 = smov %s2110_s27 }
 0x49f   : > { %s2423_s21 = smov %s2099_s24  ;;  %17 = sbr.rel (!%p15_p2) target bundleno = 3 (0x3), region = 75 }
 0x4a4   :  { %1570 = vsyncpa [#allocation3], 1 }
 0x4a5   :  { %1572 = vsyncpa [#allocation3 + $0x1], 1 }

</bundles_post_ra>
